<compile_context>
chip_gen: v7x
topology: tpu7x:2x2x1
jax: 0.10.0
libtpu: 0.0.40
codegen_flags: <defaults>
</compile_context>

<pallas_src>
import functools

import jax
import jax.numpy as jnp
from jax.experimental import pallas as pl
from jax.experimental.pallas import tpu as pltpu


def _mha_kernel(x_ref, wqkv_ref, wp_ref, bp_ref, o_ref, heads_ref, *,
                n_head, head_size):
    """Fused multi-head causal self-attention for one block of batch elements.

    x_ref:     (Bb, T, Cp)      activations (compute dtype, channel-padded)
    wqkv_ref:  (Cp, 3*H*hs)     fused QKV weights (Q pre-scaled by hs^-0.5)
    wp_ref:    (H*hs, Cp)       output projection weight
    bp_ref:    (1, Cp)          output projection bias (f32)
    o_ref:     (Bb, T, Cp)
    heads_ref: (Bb*T, H*hs)     VMEM scratch: concatenated head outputs
    """
    Bb, T, Cp = x_ref.shape
    H, hs = n_head, head_size
    cdt = wqkv_ref.dtype          # MXU operand dtype (bf16); accumulation is f32
    rows = Bb * T

    # --- fused QKV projection: one wide MXU matmul over all heads & rows ---
    x2d = x_ref[...].reshape(rows, Cp)                       # leading-dim merge: free
    qkv = jnp.dot(x2d, wqkv_ref[...],
                  preferred_element_type=jnp.float32)        # (rows, 3*H*hs) f32

    # Causal mask as an additive bias, built once and reused by every head.
    # Kept in f32 on purpose: -1e30 would overflow if the scores were bf16.
    row = jax.lax.broadcasted_iota(jnp.int32, (T, T), 0)
    col = jax.lax.broadcasted_iota(jnp.int32, (T, T), 1)
    mask_bias = jnp.where(row >= col, jnp.float32(0.0), jnp.float32(-1e30))

    # Static loop over heads (H is small).  Each head's output is stored at a
    # static lane offset in VMEM scratch -- a plain store, not an XLU concat.
    for h in range(H):
        q = qkv[:, h * hs:(h + 1) * hs].astype(cdt).reshape(Bb, T, hs)
        k = qkv[:, (H + h) * hs:(H + h + 1) * hs].astype(cdt).reshape(Bb, T, hs)
        v = qkv[:, (2 * H + h) * hs:(2 * H + h + 1) * hs].astype(cdt).reshape(Bb, T, hs)

        s = jnp.einsum('btd,bsd->bts', q, k,
                       preferred_element_type=jnp.float32)   # (Bb, T, T) f32
        s = s + mask_bias                                    # broadcast over batch

        m = jnp.max(s, axis=-1, keepdims=True)               # softmax stays f32
        p = jnp.exp(s - m)
        denom = jnp.sum(p, axis=-1, keepdims=True)
        p = p * pl.reciprocal(denom, approx=True)            # EUP, not VALU divide

        ho = jnp.einsum('bts,bsd->btd', p.astype(cdt), v,
                        preferred_element_type=jnp.float32)  # (Bb, T, hs)
        heads_ref[:, h * hs:(h + 1) * hs] = ho.reshape(rows, hs).astype(cdt)

    # --- ONE wide output projection matmul over all heads ---
    out = jnp.dot(heads_ref[...], wp_ref[...],
                  preferred_element_type=jnp.float32)        # (rows, Cp) f32
    out = out + bp_ref[...]
    o_ref[...] = out.reshape(Bb, T, Cp).astype(o_ref.dtype)


def multi_head_attention(x, wq, wk, wv, wp, bp, *,
                         compute_dtype=jnp.bfloat16, grid_steps=None):
    """x: (B,T,C); wq/wk/wv: (H,C,hs); wp: (H*hs,C); bp: (1,C)."""
    B, T, C = x.shape
    H, _, hs = wq.shape
    assert wp.shape == (H * hs, C) and bp.shape == (1, C)
    out_dtype = x.dtype

    # ---- parameter prep (done once, wrapper side) ----
    #  - fold the 1/sqrt(hs) softmax scale into the Q weights,
    #  - fuse Q/K/V into a single (C, 3*H*hs) weight (head-major per group),
    #  - downcast matmul operands (and x) to bf16; kernel accumulates in f32.
    scale = hs ** (-0.5)
    wqkv = jnp.concatenate([
        jnp.transpose(wq * scale, (1, 0, 2)).reshape(C, H * hs),
        jnp.transpose(wk, (1, 0, 2)).reshape(C, H * hs),
        jnp.transpose(wv, (1, 0, 2)).reshape(C, H * hs),
    ], axis=-1).astype(compute_dtype)

    # Lane-dense HBM I/O: pad the channel axis to a multiple of 128 so the
    # kernel's loads/stores use full-lane vst instead of masked vst.msk.
    # Zero-padded weight rows / bias columns keep the math identical; the
    # padded output columns are sliced off below.  No-op when C % 128 == 0.
    C_pad = -(-C // 128) * 128
    pad = C_pad - C
    x_in = jnp.pad(x, ((0, 0), (0, 0), (0, pad))).astype(compute_dtype)
    wqkv = jnp.pad(wqkv, ((0, pad), (0, 0)))
    wp_in = jnp.pad(wp, ((0, 0), (0, pad))).astype(compute_dtype)
    bp_in = jnp.pad(bp, ((0, 0), (0, pad))).astype(jnp.float32)

    # ---- grid: one step per TensorCore (1 on v5e/v6e, 2 on v7x) ----
    if grid_steps is None:
        try:
            n_cores = int(getattr(pltpu.get_tpu_info(), "num_cores", 1) or 1)
        except Exception:
            n_cores = 1
        grid_steps = n_cores if (1 < n_cores <= B and B % n_cores == 0) else 1
    assert B % grid_steps == 0
    Bb = B // grid_steps
    rows = Bb * T

    # ---- explicit VMEM budget (scoped default is only 16 MiB on v5e) ----
    cb = jnp.dtype(compute_dtype).itemsize
    ob = jnp.dtype(out_dtype).itemsize
    est = (2 * rows * C_pad * cb            # x blocks (double-buffered)
           + 2 * rows * C_pad * ob          # out blocks
           + 2 * C_pad * 3 * H * hs * cb    # fused QKV weights
           + 2 * H * hs * C_pad * cb        # projection weights
           + 2 * 8 * C_pad * 4              # bias (sublane-padded)
           + rows * 3 * H * hs * 4          # f32 QKV activations
           + 2 * Bb * T * T * 4             # one head's f32 score/prob slab
           + rows * H * hs * cb             # per-head output slab (scratch)
           + rows * C_pad * 4)              # f32 projection accumulator
    vmem_limit = int(min(max(2 * est + (1 << 20), 32 << 20), 64 << 20))

    kernel = functools.partial(_mha_kernel, n_head=H, head_size=hs)
    out = pl.pallas_call(
        kernel,
        out_shape=jax.ShapeDtypeStruct((B, T, C_pad), out_dtype),
        grid_spec=pltpu.PrefetchScalarGridSpec(
            num_scalar_prefetch=0,
            grid=(grid_steps,),
            in_specs=[
                pl.BlockSpec((Bb, T, C_pad), lambda b: (b, 0, 0)),      # x block
                pl.BlockSpec((C_pad, 3 * H * hs), lambda b: (0, 0)),    # fused Wqkv
                pl.BlockSpec((H * hs, C_pad), lambda b: (0, 0)),        # Wproj
                pl.BlockSpec((1, C_pad), lambda b: (0, 0)),             # proj bias
            ],
            out_specs=pl.BlockSpec((Bb, T, C_pad), lambda b: (b, 0, 0)),
            scratch_shapes=[pltpu.VMEM((rows, H * hs), compute_dtype)],
        ),
        compiler_params=pltpu.CompilerParams(
            dimension_semantics=("parallel",),
            vmem_limit_bytes=vmem_limit),
    )(x_in, wqkv, wp_in, bp_in)
    return out[..., :C] if pad else out


def reference_mha(x, wq, wk, wv, wp, bp):
    """Plain-JAX f32 reference matching the PyTorch forward (eval mode)."""
    B, T, C = x.shape
    n_head, _, hs = wq.shape
    q = jnp.einsum('btc,hcd->bhtd', x, wq)
    k = jnp.einsum('btc,hcd->bhtd', x, wk)
    v = jnp.einsum('btc,hcd->bhtd', x, wv)
    s = jnp.einsum('bhtd,bhsd->bhts', q, k) * hs ** (-0.5)
    mask = jnp.tril(jnp.ones((T, T), dtype=bool))
    s = jnp.where(mask, s, -jnp.inf)
    p = jax.nn.softmax(s, axis=-1)
    o = jnp.einsum('bhts,bhsd->bhtd', p, v)                 # (B, H, T, hs)
    cat = o.transpose(0, 2, 1, 3).reshape(B, T, n_head * hs)
    return cat @ wp + bp[0]


if __name__ == "__main__":
    # Small shapes consistent with the module: B=2, T=block_size=8,
    # n_embed=32, n_head=4, head_size=8, dropout=0.0 (eval).
    B, T = 2, 8
    n_embed, n_head, head_size = 32, 4, 8

    key = jax.random.PRNGKey(0)
    kx, kq, kk, kv, kpw, kpb = jax.random.split(key, 6)

    x = jax.random.normal(kx, (B, T, n_embed), dtype=jnp.float32)
    # nn.Linear(n_embed, head_size, bias=False).weight is (head_size, n_embed);
    # we store the transpose (n_embed, head_size) per head for x @ W.
    wq = jax.random.normal(kq, (n_head, n_embed, head_size), jnp.float32) * 0.1
    wk = jax.random.normal(kk, (n_head, n_embed, head_size), jnp.float32) * 0.1
    wv = jax.random.normal(kv, (n_head, n_embed, head_size), jnp.float32) * 0.1
    # nn.Linear(head_size*n_head, n_embed).weight is (n_embed, H*hs); store transpose.
    wp = jax.random.normal(kpw, (n_head * head_size, n_embed), jnp.float32) * 0.1
    bp = jax.random.normal(kpb, (1, n_embed), jnp.float32) * 0.1

    out = jax.block_until_ready(multi_head_attention(x, wq, wk, wv, wp, bp))
    ref = reference_mha(x, wq, wk, wv, wp, bp)

    assert out.shape == (B, T, n_embed)
    # bf16 MXU operands + approx reciprocal (softmax rows sum to ~1 +/- 1e-3)
    # => compare with bf16-appropriate tolerance.
    max_diff = float(jnp.max(jnp.abs(out - ref)))
    assert jnp.allclose(out, ref, atol=2e-2, rtol=2e-2), f"mismatch, max|diff|={max_diff}"

    print("KERNEL_OK")
</pallas_src>

<mosaic_0001>
module attributes {stable_mosaic.version = 11 : i64} {
  func.func @_mha_kernel(%arg0: i32, %arg1: memref<2x8x128xbf16, #tpu.memory_space<vmem>>, %arg2: memref<128x96xbf16, #tpu.memory_space<vmem>>, %arg3: memref<32x128xbf16, #tpu.memory_space<vmem>>, %arg4: memref<1x128xf32, #tpu.memory_space<vmem>>, %arg5: memref<2x8x128xf32, #tpu.memory_space<vmem>>, %arg6: memref<16x32xbf16, #tpu.memory_space<vmem>>) attributes {dimension_semantics = [#tpu.dimension_semantics<parallel>], iteration_bounds = array<i64: 1>, scalar_prefetch = 0 : i64, scratch_operands = 1 : i64, tpu.core_type = #tpu.core_type<tc>, window_params = [{transform_indices = @transform_0, window_bounds = array<i64: 2, 8, 128>}, {pipeline_mode = #tpu.pipeline_mode<synchronous>, transform_indices = @transform_1, window_bounds = array<i64: 128, 96>}, {pipeline_mode = #tpu.pipeline_mode<synchronous>, transform_indices = @transform_2, window_bounds = array<i64: 32, 128>}, {pipeline_mode = #tpu.pipeline_mode<synchronous>, transform_indices = @transform_3, window_bounds = array<i64: 1, 128>}, {transform_indices = @transform_4, window_bounds = array<i64: 2, 8, 128>}]} {
    %c0 = arith.constant 0 : index
    %c0_0 = arith.constant 0 : index
    %c0_1 = arith.constant 0 : index
    %0 = vector.load %arg1[%c0, %c0_0, %c0_1] : memref<2x8x128xbf16, #tpu.memory_space<vmem>>, vector<2x8x128xbf16>
    %1 = vector.shape_cast %0 : vector<2x8x128xbf16> to vector<16x128xbf16>
    %c0_2 = arith.constant 0 : index
    %c0_3 = arith.constant 0 : index
    %2 = vector.load %arg2[%c0_2, %c0_3] : memref<128x96xbf16, #tpu.memory_space<vmem>>, vector<128x96xbf16>
    %cst = arith.constant dense<0.000000e+00> : vector<16x96xf32>
    %3 = tpu.matmul %1, %2, %cst {dimension_numbers = #tpu.dot_dimension_numbers<[1], [0], [0], [1], [0, 0, 1, 1], [], []>} : vector<16x128xbf16>, vector<128x96xbf16>, vector<16x96xf32> -> vector<16x96xf32>
    %4 = tpu.iota {dimensions = array<i32: 0>} : vector<8x8xi32>
    %5 = tpu.iota {dimensions = array<i32: 1>} : vector<8x8xi32>
    %6 = arith.cmpi sge, %4, %5 : vector<8x8xi32>
    %cst_4 = arith.constant 0.000000e+00 : f32
    %cst_5 = arith.constant -1.000000e+30 : f32
    %7 = vector.broadcast %cst_4 : f32 to vector<8x8xf32>
    %8 = vector.broadcast %cst_5 : f32 to vector<8x8xf32>
    %9 = arith.select %6, %7, %8 : vector<8x8xi1>, vector<8x8xf32>
    %10 = vector.extract_strided_slice %3 {offsets = [0, 0], sizes = [16, 8], strides = [1, 1]} : vector<16x96xf32> to vector<16x8xf32>
    %11 = arith.truncf %10 : vector<16x8xf32> to vector<16x8xbf16>
    %12 = vector.shape_cast %11 : vector<16x8xbf16> to vector<2x8x8xbf16>
    %13 = vector.extract_strided_slice %3 {offsets = [0, 32], sizes = [16, 8], strides = [1, 1]} : vector<16x96xf32> to vector<16x8xf32>
    %14 = arith.truncf %13 : vector<16x8xf32> to vector<16x8xbf16>
    %15 = vector.shape_cast %14 : vector<16x8xbf16> to vector<2x8x8xbf16>
    %16 = vector.extract_strided_slice %3 {offsets = [0, 64], sizes = [16, 8], strides = [1, 1]} : vector<16x96xf32> to vector<16x8xf32>
    %17 = arith.truncf %16 : vector<16x8xf32> to vector<16x8xbf16>
    %18 = vector.shape_cast %17 : vector<16x8xbf16> to vector<2x8x8xbf16>
    "tpu.trace_start"() <{level = 10 : i32, message = "btd,bsd->bts"}> : () -> ()
    %cst_6 = arith.constant dense<0.000000e+00> : vector<2x8x8xf32>
    %19 = tpu.matmul %12, %15, %cst_6 {dimension_numbers = #tpu.dot_dimension_numbers<[2], [2], [1], [1], [0, 0, 0, 1, 1, 1], [0], [0]>} : vector<2x8x8xbf16>, vector<2x8x8xbf16>, vector<2x8x8xf32> -> vector<2x8x8xf32>
    "tpu.trace_stop"() : () -> ()
    %20 = vector.shape_cast %9 : vector<8x8xf32> to vector<1x8x8xf32>
    %21 = vector.broadcast %20 : vector<1x8x8xf32> to vector<2x8x8xf32>
    %22 = arith.addf %19, %21 : vector<2x8x8xf32>
    %cst_7 = arith.constant dense<0xFF800000> : vector<2x8xf32>
    %23 = vector.multi_reduction <maximumf>, %22, %cst_7 [2] : vector<2x8x8xf32> to vector<2x8xf32>
    %24 = vector.shape_cast %23 : vector<2x8xf32> to vector<2x8x1xf32>
    %25 = vector.broadcast %24 : vector<2x8x1xf32> to vector<2x8x8xf32>
    %26 = arith.subf %22, %25 : vector<2x8x8xf32>
    %27 = math.exp %26 : vector<2x8x8xf32>
    %cst_8 = arith.constant dense<0.000000e+00> : vector<2x8xf32>
    %28 = vector.multi_reduction <add>, %27, %cst_8 [2] : vector<2x8x8xf32> to vector<2x8xf32>
    %29 = vector.shape_cast %28 : vector<2x8xf32> to vector<2x8x1xf32>
    %30 = tpu.reciprocal %29 {approx = true} : vector<2x8x1xf32> -> vector<2x8x1xf32>
    %31 = vector.broadcast %30 : vector<2x8x1xf32> to vector<2x8x8xf32>
    %32 = arith.mulf %27, %31 : vector<2x8x8xf32>
    %33 = arith.truncf %32 : vector<2x8x8xf32> to vector<2x8x8xbf16>
    "tpu.trace_start"() <{level = 10 : i32, message = "bts,bsd->btd"}> : () -> ()
    %cst_9 = arith.constant dense<0.000000e+00> : vector<2x8x8xf32>
    %34 = tpu.matmul %33, %18, %cst_9 {dimension_numbers = #tpu.dot_dimension_numbers<[2], [1], [1], [2], [0, 0, 0, 1, 1, 2], [0], [0]>} : vector<2x8x8xbf16>, vector<2x8x8xbf16>, vector<2x8x8xf32> -> vector<2x8x8xf32>
    "tpu.trace_stop"() : () -> ()
    %35 = vector.shape_cast %34 : vector<2x8x8xf32> to vector<16x8xf32>
    %36 = arith.truncf %35 : vector<16x8xf32> to vector<16x8xbf16>
    %c0_10 = arith.constant 0 : index
    %c0_11 = arith.constant 0 : index
    %37 = vector.load %arg6[%c0_10, %c0_11] : memref<16x32xbf16, #tpu.memory_space<vmem>>, vector<16x8xbf16>
    tpu.vector_store %arg6[%c0_10, %c0_11], %36 {strides = array<i32>} : memref<16x32xbf16, #tpu.memory_space<vmem>>, vector<16x8xbf16>,
    %38 = vector.extract_strided_slice %3 {offsets = [0, 8], sizes = [16, 8], strides = [1, 1]} : vector<16x96xf32> to vector<16x8xf32>
    %39 = arith.truncf %38 : vector<16x8xf32> to vector<16x8xbf16>
    %40 = vector.shape_cast %39 : vector<16x8xbf16> to vector<2x8x8xbf16>
    %41 = vector.extract_strided_slice %3 {offsets = [0, 40], sizes = [16, 8], strides = [1, 1]} : vector<16x96xf32> to vector<16x8xf32>
    %42 = arith.truncf %41 : vector<16x8xf32> to vector<16x8xbf16>
    %43 = vector.shape_cast %42 : vector<16x8xbf16> to vector<2x8x8xbf16>
    %44 = vector.extract_strided_slice %3 {offsets = [0, 72], sizes = [16, 8], strides = [1, 1]} : vector<16x96xf32> to vector<16x8xf32>
    %45 = arith.truncf %44 : vector<16x8xf32> to vector<16x8xbf16>
    %46 = vector.shape_cast %45 : vector<16x8xbf16> to vector<2x8x8xbf16>
    "tpu.trace_start"() <{level = 10 : i32, message = "btd,bsd->bts"}> : () -> ()
    %cst_12 = arith.constant dense<0.000000e+00> : vector<2x8x8xf32>
    %47 = tpu.matmul %40, %43, %cst_12 {dimension_numbers = #tpu.dot_dimension_numbers<[2], [2], [1], [1], [0, 0, 0, 1, 1, 1], [0], [0]>} : vector<2x8x8xbf16>, vector<2x8x8xbf16>, vector<2x8x8xf32> -> vector<2x8x8xf32>
    "tpu.trace_stop"() : () -> ()
    %48 = vector.shape_cast %9 : vector<8x8xf32> to vector<1x8x8xf32>
    %49 = vector.broadcast %48 : vector<1x8x8xf32> to vector<2x8x8xf32>
    %50 = arith.addf %47, %49 : vector<2x8x8xf32>
    %cst_13 = arith.constant dense<0xFF800000> : vector<2x8xf32>
    %51 = vector.multi_reduction <maximumf>, %50, %cst_13 [2] : vector<2x8x8xf32> to vector<2x8xf32>
    %52 = vector.shape_cast %51 : vector<2x8xf32> to vector<2x8x1xf32>
    %53 = vector.broadcast %52 : vector<2x8x1xf32> to vector<2x8x8xf32>
    %54 = arith.subf %50, %53 : vector<2x8x8xf32>
    %55 = math.exp %54 : vector<2x8x8xf32>
    %cst_14 = arith.constant dense<0.000000e+00> : vector<2x8xf32>
    %56 = vector.multi_reduction <add>, %55, %cst_14 [2] : vector<2x8x8xf32> to vector<2x8xf32>
    %57 = vector.shape_cast %56 : vector<2x8xf32> to vector<2x8x1xf32>
    %58 = tpu.reciprocal %57 {approx = true} : vector<2x8x1xf32> -> vector<2x8x1xf32>
    %59 = vector.broadcast %58 : vector<2x8x1xf32> to vector<2x8x8xf32>
    %60 = arith.mulf %55, %59 : vector<2x8x8xf32>
    %61 = arith.truncf %60 : vector<2x8x8xf32> to vector<2x8x8xbf16>
    "tpu.trace_start"() <{level = 10 : i32, message = "bts,bsd->btd"}> : () -> ()
    %cst_15 = arith.constant dense<0.000000e+00> : vector<2x8x8xf32>
    %62 = tpu.matmul %61, %46, %cst_15 {dimension_numbers = #tpu.dot_dimension_numbers<[2], [1], [1], [2], [0, 0, 0, 1, 1, 2], [0], [0]>} : vector<2x8x8xbf16>, vector<2x8x8xbf16>, vector<2x8x8xf32> -> vector<2x8x8xf32>
    "tpu.trace_stop"() : () -> ()
    %63 = vector.shape_cast %62 : vector<2x8x8xf32> to vector<16x8xf32>
    %64 = arith.truncf %63 : vector<16x8xf32> to vector<16x8xbf16>
    %c0_16 = arith.constant 0 : index
    %c8 = arith.constant 8 : index
    %65 = vector.load %arg6[%c0_16, %c8] : memref<16x32xbf16, #tpu.memory_space<vmem>>, vector<16x8xbf16>
    tpu.vector_store %arg6[%c0_16, %c8], %64 {strides = array<i32>} : memref<16x32xbf16, #tpu.memory_space<vmem>>, vector<16x8xbf16>,
    %66 = vector.extract_strided_slice %3 {offsets = [0, 16], sizes = [16, 8], strides = [1, 1]} : vector<16x96xf32> to vector<16x8xf32>
    %67 = arith.truncf %66 : vector<16x8xf32> to vector<16x8xbf16>
    %68 = vector.shape_cast %67 : vector<16x8xbf16> to vector<2x8x8xbf16>
    %69 = vector.extract_strided_slice %3 {offsets = [0, 48], sizes = [16, 8], strides = [1, 1]} : vector<16x96xf32> to vector<16x8xf32>
    %70 = arith.truncf %69 : vector<16x8xf32> to vector<16x8xbf16>
    %71 = vector.shape_cast %70 : vector<16x8xbf16> to vector<2x8x8xbf16>
    %72 = vector.extract_strided_slice %3 {offsets = [0, 80], sizes = [16, 8], strides = [1, 1]} : vector<16x96xf32> to vector<16x8xf32>
    %73 = arith.truncf %72 : vector<16x8xf32> to vector<16x8xbf16>
    %74 = vector.shape_cast %73 : vector<16x8xbf16> to vector<2x8x8xbf16>
    "tpu.trace_start"() <{level = 10 : i32, message = "btd,bsd->bts"}> : () -> ()
    %cst_17 = arith.constant dense<0.000000e+00> : vector<2x8x8xf32>
    %75 = tpu.matmul %68, %71, %cst_17 {dimension_numbers = #tpu.dot_dimension_numbers<[2], [2], [1], [1], [0, 0, 0, 1, 1, 1], [0], [0]>} : vector<2x8x8xbf16>, vector<2x8x8xbf16>, vector<2x8x8xf32> -> vector<2x8x8xf32>
    "tpu.trace_stop"() : () -> ()
    %76 = vector.shape_cast %9 : vector<8x8xf32> to vector<1x8x8xf32>
    %77 = vector.broadcast %76 : vector<1x8x8xf32> to vector<2x8x8xf32>
    %78 = arith.addf %75, %77 : vector<2x8x8xf32>
    %cst_18 = arith.constant dense<0xFF800000> : vector<2x8xf32>
    %79 = vector.multi_reduction <maximumf>, %78, %cst_18 [2] : vector<2x8x8xf32> to vector<2x8xf32>
    %80 = vector.shape_cast %79 : vector<2x8xf32> to vector<2x8x1xf32>
    %81 = vector.broadcast %80 : vector<2x8x1xf32> to vector<2x8x8xf32>
    %82 = arith.subf %78, %81 : vector<2x8x8xf32>
    %83 = math.exp %82 : vector<2x8x8xf32>
    %cst_19 = arith.constant dense<0.000000e+00> : vector<2x8xf32>
    %84 = vector.multi_reduction <add>, %83, %cst_19 [2] : vector<2x8x8xf32> to vector<2x8xf32>
    %85 = vector.shape_cast %84 : vector<2x8xf32> to vector<2x8x1xf32>
    %86 = tpu.reciprocal %85 {approx = true} : vector<2x8x1xf32> -> vector<2x8x1xf32>
    %87 = vector.broadcast %86 : vector<2x8x1xf32> to vector<2x8x8xf32>
    %88 = arith.mulf %83, %87 : vector<2x8x8xf32>
    %89 = arith.truncf %88 : vector<2x8x8xf32> to vector<2x8x8xbf16>
    "tpu.trace_start"() <{level = 10 : i32, message = "bts,bsd->btd"}> : () -> ()
    %cst_20 = arith.constant dense<0.000000e+00> : vector<2x8x8xf32>
    %90 = tpu.matmul %89, %74, %cst_20 {dimension_numbers = #tpu.dot_dimension_numbers<[2], [1], [1], [2], [0, 0, 0, 1, 1, 2], [0], [0]>} : vector<2x8x8xbf16>, vector<2x8x8xbf16>, vector<2x8x8xf32> -> vector<2x8x8xf32>
    "tpu.trace_stop"() : () -> ()
    %91 = vector.shape_cast %90 : vector<2x8x8xf32> to vector<16x8xf32>
    %92 = arith.truncf %91 : vector<16x8xf32> to vector<16x8xbf16>
    %c0_21 = arith.constant 0 : index
    %c16 = arith.constant 16 : index
    %93 = vector.load %arg6[%c0_21, %c16] : memref<16x32xbf16, #tpu.memory_space<vmem>>, vector<16x8xbf16>
    tpu.vector_store %arg6[%c0_21, %c16], %92 {strides = array<i32>} : memref<16x32xbf16, #tpu.memory_space<vmem>>, vector<16x8xbf16>,
    %94 = vector.extract_strided_slice %3 {offsets = [0, 24], sizes = [16, 8], strides = [1, 1]} : vector<16x96xf32> to vector<16x8xf32>
    %95 = arith.truncf %94 : vector<16x8xf32> to vector<16x8xbf16>
    %96 = vector.shape_cast %95 : vector<16x8xbf16> to vector<2x8x8xbf16>
    %97 = vector.extract_strided_slice %3 {offsets = [0, 56], sizes = [16, 8], strides = [1, 1]} : vector<16x96xf32> to vector<16x8xf32>
    %98 = arith.truncf %97 : vector<16x8xf32> to vector<16x8xbf16>
    %99 = vector.shape_cast %98 : vector<16x8xbf16> to vector<2x8x8xbf16>
    %100 = vector.extract_strided_slice %3 {offsets = [0, 88], sizes = [16, 8], strides = [1, 1]} : vector<16x96xf32> to vector<16x8xf32>
    %101 = arith.truncf %100 : vector<16x8xf32> to vector<16x8xbf16>
    %102 = vector.shape_cast %101 : vector<16x8xbf16> to vector<2x8x8xbf16>
    "tpu.trace_start"() <{level = 10 : i32, message = "btd,bsd->bts"}> : () -> ()
    %cst_22 = arith.constant dense<0.000000e+00> : vector<2x8x8xf32>
    %103 = tpu.matmul %96, %99, %cst_22 {dimension_numbers = #tpu.dot_dimension_numbers<[2], [2], [1], [1], [0, 0, 0, 1, 1, 1], [0], [0]>} : vector<2x8x8xbf16>, vector<2x8x8xbf16>, vector<2x8x8xf32> -> vector<2x8x8xf32>
    "tpu.trace_stop"() : () -> ()
    %104 = vector.shape_cast %9 : vector<8x8xf32> to vector<1x8x8xf32>
    %105 = vector.broadcast %104 : vector<1x8x8xf32> to vector<2x8x8xf32>
    %106 = arith.addf %103, %105 : vector<2x8x8xf32>
    %cst_23 = arith.constant dense<0xFF800000> : vector<2x8xf32>
    %107 = vector.multi_reduction <maximumf>, %106, %cst_23 [2] : vector<2x8x8xf32> to vector<2x8xf32>
    %108 = vector.shape_cast %107 : vector<2x8xf32> to vector<2x8x1xf32>
    %109 = vector.broadcast %108 : vector<2x8x1xf32> to vector<2x8x8xf32>
    %110 = arith.subf %106, %109 : vector<2x8x8xf32>
    %111 = math.exp %110 : vector<2x8x8xf32>
    %cst_24 = arith.constant dense<0.000000e+00> : vector<2x8xf32>
    %112 = vector.multi_reduction <add>, %111, %cst_24 [2] : vector<2x8x8xf32> to vector<2x8xf32>
    %113 = vector.shape_cast %112 : vector<2x8xf32> to vector<2x8x1xf32>
    %114 = tpu.reciprocal %113 {approx = true} : vector<2x8x1xf32> -> vector<2x8x1xf32>
    %115 = vector.broadcast %114 : vector<2x8x1xf32> to vector<2x8x8xf32>
    %116 = arith.mulf %111, %115 : vector<2x8x8xf32>
    %117 = arith.truncf %116 : vector<2x8x8xf32> to vector<2x8x8xbf16>
    "tpu.trace_start"() <{level = 10 : i32, message = "bts,bsd->btd"}> : () -> ()
    %cst_25 = arith.constant dense<0.000000e+00> : vector<2x8x8xf32>
    %118 = tpu.matmul %117, %102, %cst_25 {dimension_numbers = #tpu.dot_dimension_numbers<[2], [1], [1], [2], [0, 0, 0, 1, 1, 2], [0], [0]>} : vector<2x8x8xbf16>, vector<2x8x8xbf16>, vector<2x8x8xf32> -> vector<2x8x8xf32>
    "tpu.trace_stop"() : () -> ()
    %119 = vector.shape_cast %118 : vector<2x8x8xf32> to vector<16x8xf32>
    %120 = arith.truncf %119 : vector<16x8xf32> to vector<16x8xbf16>
    %c0_26 = arith.constant 0 : index
    %c24 = arith.constant 24 : index
    %121 = vector.load %arg6[%c0_26, %c24] : memref<16x32xbf16, #tpu.memory_space<vmem>>, vector<16x8xbf16>
    tpu.vector_store %arg6[%c0_26, %c24], %120 {strides = array<i32>} : memref<16x32xbf16, #tpu.memory_space<vmem>>, vector<16x8xbf16>,
    %c0_27 = arith.constant 0 : index
    %c0_28 = arith.constant 0 : index
    %122 = vector.load %arg6[%c0_27, %c0_28] : memref<16x32xbf16, #tpu.memory_space<vmem>>, vector<16x32xbf16>
    %c0_29 = arith.constant 0 : index
    %c0_30 = arith.constant 0 : index
    %123 = vector.load %arg3[%c0_29, %c0_30] : memref<32x128xbf16, #tpu.memory_space<vmem>>, vector<32x128xbf16>
    %cst_31 = arith.constant dense<0.000000e+00> : vector<16x128xf32>
    %124 = tpu.matmul %122, %123, %cst_31 {dimension_numbers = #tpu.dot_dimension_numbers<[1], [0], [0], [1], [0, 0, 1, 1], [], []>} : vector<16x32xbf16>, vector<32x128xbf16>, vector<16x128xf32> -> vector<16x128xf32>
    %c0_32 = arith.constant 0 : index
    %c0_33 = arith.constant 0 : index
    %125 = vector.load %arg4[%c0_32, %c0_33] : memref<1x128xf32, #tpu.memory_space<vmem>>, vector<1x128xf32>
    %126 = vector.broadcast %125 : vector<1x128xf32> to vector<16x128xf32>
    %127 = arith.addf %124, %126 : vector<16x128xf32>
    %128 = vector.shape_cast %127 : vector<16x128xf32> to vector<2x8x128xf32>
    %c0_34 = arith.constant 0 : index
    %c0_35 = arith.constant 0 : index
    %c0_36 = arith.constant 0 : index
    %129 = vector.load %arg5[%c0_34, %c0_35, %c0_36] : memref<2x8x128xf32, #tpu.memory_space<vmem>>, vector<2x8x128xf32>
    tpu.vector_store %arg5[%c0_34, %c0_35, %c0_36], %128 {strides = array<i32>} : memref<2x8x128xf32, #tpu.memory_space<vmem>>, vector<2x8x128xf32>,
    return
  }
  func.func @transform_0(%arg0: i32) -> (i32, i32, i32) {
    %c0_i32 = arith.constant 0 : i32
    %c0_i32_0 = arith.constant 0 : i32
    %c0_i32_1 = arith.constant 0 : i32
    return %arg0, %c0_i32, %c0_i32_0 : i32, i32, i32
  }
  func.func @transform_1(%arg0: i32) -> (i32, i32) {
    %c0_i32 = arith.constant 0 : i32
    %c0_i32_0 = arith.constant 0 : i32
    %c0_i32_1 = arith.constant 0 : i32
    return %c0_i32, %c0_i32_0 : i32, i32
  }
  func.func @transform_2(%arg0: i32) -> (i32, i32) {
    %c0_i32 = arith.constant 0 : i32
    %c0_i32_0 = arith.constant 0 : i32
    %c0_i32_1 = arith.constant 0 : i32
    return %c0_i32, %c0_i32_0 : i32, i32
  }
  func.func @transform_3(%arg0: i32) -> (i32, i32) {
    %c0_i32 = arith.constant 0 : i32
    %c0_i32_0 = arith.constant 0 : i32
    %c0_i32_1 = arith.constant 0 : i32
    return %c0_i32, %c0_i32_0 : i32, i32
  }
  func.func @transform_4(%arg0: i32) -> (i32, i32, i32) {
    %c0_i32 = arith.constant 0 : i32
    %c0_i32_0 = arith.constant 0 : i32
    %c0_i32_1 = arith.constant 0 : i32
    return %arg0, %c0_i32, %c0_i32_0 : i32, i32, i32
  }
}

</mosaic_0001>

<bundles_post_ra>
// kernel: tpu_custom_call.1
= control target key start
LH: loop header
LB: loop body
LE: loop exit
PB: predicated region body
PF: predicated region fallthrough
CT: control target
= control target key end

     0   :  { %v1419_v1 = vmov 0.0   ;;  %vm1420_vm0 = vmmov 0   ;;  %s1671_s0 = inlined_call_operand.vmem [shape: bf16[2,8,128], index: 0, kind: input, shape index: {}]   ;;  %s1672_s1 = inlined_call_operand.vmem [shape: bf16[128,96], index: 1, kind: input, shape index: {}]   ;;  %s1673_s2 = inlined_call_operand.vmem [shape: bf16[32,128], index: 2, kind: input, shape index: {}]   ;;  %s1674_s3 = inlined_call_operand.vmem [shape: f32[1,128], index: 3, kind: input, shape index: {}]   ;;  %s1675_s4 = inlined_call_operand.hbm [shape: f32[2,8,128], index: 4, kind: output, shape index: {}]  }
   0x1   :  { %v1352_v0 = vld [vmem:[%s1672_s1] sm:$0xff]   ;;  %1209 = vmatprep.subr.bf16.mxu0 %v1419_v1  ;;  %1229 = vmatprep.subr.bf16.mxu1 %v1419_v1  ;;  %v1353_v2 = vld [vmem:[%s1672_s1 + $0x8] sm:$0xff]   ;;  %v1354_v3 = vld [vmem:[%s1672_s1 + $0x10] sm:$0xff]  }
   0x2   :  { %1210 = vmatpush3.bf16.msra.mxu0 %v1352_v0  ;;  %1225 = vmatprep.mubr.msk.bf16.mxu0 %vm1420_vm0, %v1419_v1  ;;  %v1355_v4 = vld [vmem:[%s1672_s1 + $0x18] sm:$0xff]  }
   0x3   :  { %1211 = vmatprep.subr.bf16.mxu0 %v1419_v1  ;;  %1231 = vmatprep.mubr.msk.bf16.mxu1 %vm1420_vm0, %v1419_v1 }
   0x6   :  { %1212 = vmatpush3.bf16.msra.mxu0 %v1353_v2 }
   0x7   :  { %1213 = vmatprep.subr.bf16.mxu0 %v1419_v1 }
   0xa   :  { %1214 = vmatpush3.bf16.msra.mxu0 %v1354_v3 }
   0xb   :  { %9 = vsyncpa [#allocation4], 0  ;;  %1215 = vmatprep.subr.bf16.mxu0 %v1419_v1  ;;  %v1356_v5 = vld [vmem:[%s1672_s1 + $0x20] sm:$0xff]   ;;  %v1357_v6 = vld [vmem:[%s1672_s1 + $0x28] sm:$0xff]   ;;  %s1421_s7 = smov 96   ;;  %vm146_vm1 = vcmask 64512   ;;  %v132_v20 = vlaneseq }
   0xc   :  { %v1358_v7 = vld [vmem:[%s1672_s1 + $0x30] sm:$0xff]   ;;  %v1359_v8 = vld [vmem:[%s1672_s1 + $0x38] sm:$0xff]   ;;  %v1360_v9 = vld [vmem:[%s1671_s0] sm:$0xff]   ;;  %v1422_v23 = vmov -1e+30   ;;  %s1423_s0 = smov 64  }
   0xd   :  { %v133_v21 = vshrl.u32 %v132_v20, 7  ;;  %v135_v22 = vand.u32 127, %v132_v20  ;;  %s1424_s1 = smov 88   ;;  %vm270_vm3 = vcmask 1043456   ;;  %s1425_s8 = smov 120   ;;  %vm589_vm4 = vcmask 130112  }
   0xe   :  { %1216 = vmatpush3.bf16.msra.mxu0 %v1355_v4  ;;  %s1426_s9 = smov 56   ;;  %s1427_s10 = smov 112   ;;  %vm816_vm5 = vcmask 195712   ;;  %vm1043_vm6 = vcmask 261312   ;;  %vm1069_vm7 = vcmask 261120  }
   0xf   :  { %1217 = vmatprep.subr.bf16.mxu0 %v1419_v1  ;;  %vm136_vm2 = vcmp.ge.s32.totalorder %v133_v21, %v135_v22  ;;  %s1428_s11 = smov 80   ;;  %s1429_s12 = smov 48  }
  0x10   :  { %v1524_v24 = vsel %vm136_vm2, 0.0, %v1422_v23  ;;  %s1430_s13 = smov 72   ;;  %s1431_s14 = smov 104  }
  0x11   :  { %s1432_s15 = smov 40   ;;  %s1433_s16 = smov 8  }
  0x12   :  { %1218 = vmatpush3.bf16.msra.mxu0 %v1356_v5  ;;  %s1434_s17 = smov 16   ;;  %s1435_s22 = smov 24  }
  0x13   :  { %1219 = vmatprep.subr.bf16.mxu0 %v1419_v1 }
  0x16   :  { %1220 = vmatpush3.bf16.msra.mxu0 %v1357_v6 }
  0x17   :  { %1221 = vmatprep.subr.bf16.mxu0 %v1419_v1 }
  0x1a   :  { %1222 = vmatpush3.bf16.msra.mxu0 %v1358_v7 }
  0x1b   :  { %1223 = vmatprep.subr.bf16.mxu0 %v1419_v1 }
  0x1e   :  { %1224 = vmatpush3.bf16.msra.mxu0 %v1359_v8 }
  0x1f   :  { %1253 = vmatprep.subr.bf16.mxu0 %v1419_v1 }
  0x21   :  { %1226 = vmatmul.mubr.bf16.vlgmr.msra.gmra.mrb[0].mxu0 %v1360_v9 }
  0x22   :  { %1255 = vmatprep.mubr.msk.bf16.mxu0 %vm1420_vm0, %v1419_v1 }
  0xf4   :  { %v125_v10 = vpop.f32.mrb[0].mxu0 }
  0xf5   :  { %v1506_v11 = vpack.c.bf16 %v125_v10, %v125_v10  ;;  %v1227_v12 = vpop.f32.mrb[1].mxu0 }
  0xf6   :  { %v128_v13 = vpop.f32.mrb[2].mxu0 }
  0xf7   :  { %144 = vrot.lane.b32.xlu0 %v1506_v11, %s1421_s7  ;;  %v1228_v14 = vpop.f32.mrb[3].mxu0  ;;  %v1509_v15 = vpack.c.bf16 %v128_v13, %v128_v13 }
  0xfb   :  { %193 = vrot.lane.b32.xlu0 %v1509_v15, %s1421_s7 }
 0x169   :  { %v145_v16 = vpop.permute.xlu0 %144 }
 0x16a   :  { %v151_v17 = vsel %vm146_vm1, %v145_v16, 0 }
 0x16b   :  { %1230 = vmatpush3.bf16.xpose.msra.mxu1 %v151_v17 }
 0x16c   :  { %1235 = vmatprep.subr.bf16.mxu1 %v1419_v1 }
 0x16d   :  { %v194_v18 = vpop.permute.xlu0 %193 }
 0x16e   :  { %v199_v19 = vsel %vm146_vm1, %v194_v18, 0 }
 0x172   :  { %1232 = vmatmul.mubr.msk.bf16.vlgmr.msra.gmra.mrb[0].mxu1 %vm146_vm1, %v1506_v11 }
 0x173   :  { %1236 = vmatpush3.bf16.xpose.msra.mxu1 %v199_v19  ;;  %1237 = vmatprep.mubr.msk.bf16.mxu1 %vm1420_vm0, %v1419_v1 }
 0x174   :  { %1241 = vmatprep.subr.bf16.mxu1 %v1419_v1 }
 0x17a   :  { %1238 = vmatmul.mubr.msk.bf16.vlgmr.msra.gmra.mrb[4].mxu1 %vm146_vm1, %v1509_v15 }
 0x17b   :  { %1243 = vmatprep.mubr.msk.bf16.mxu1 %vm1420_vm0, %v1419_v1 }
 0x245   :  { %v187_v25 = vpop.f32.mrb[0].mxu1 }
 0x246   :  { %v188_v26 = vadd.f32 %v187_v25, %v1524_v24  ;;  %v1233_v27 = vpop.f32.mrb[1].mxu1 }
 0x247   :  { %v190_v28 = vpop.f32.mrb[2].mxu1 }
 0x248   :  { %v1234_v29 = vpop.f32.mrb[3].mxu1  ;;  %v241_v30 = vsel %vm146_vm1, %v188_v26, -inf }
 0x249   :  { %242 = vmax.xlane.f32.xlu1 %v241_v30 }
 0x24d   :  { %v235_v31 = vpop.f32.mrb[4].mxu1 }
 0x24e   :  { %v236_v32 = vadd.f32 %v235_v31, %v1524_v24  ;;  %v1239_v33 = vpop.f32.mrb[5].mxu1 }
 0x24f   :  { %v238_v34 = vpop.f32.mrb[6].mxu1 }
 0x250   :  { %v1240_v35 = vpop.f32.mrb[7].mxu1  ;;  %v244_v36 = vsel %vm146_vm1, %v236_v32, -inf }
 0x251   :  { %245 = vmax.xlane.f32.xlu1 %v244_v36 }
 0x262   :  { %265 = vrot.lane.b32.xlu1 %v1506_v11, %s1423_s0 }
 0x266   :  { %314 = vrot.lane.b32.xlu1 %v1509_v15, %s1423_s0 }
 0x26a   :  { %366 = vrot.lane.b32.xlu1 %v1506_v11, %s1424_s1 }
 0x2d6   :  { %v243_v37 = vpop.xlane.xlu1 %242 }
 0x2d7   :  { %v247_v38 = vsub.f32 %v188_v26, %v243_v37 }
 0x2d9   :  { %v249_v39 = vmul.f32 1.442695, %v247_v38 }
 0x2db   :  { %1363 = vpow2.f32 %v249_v39 }
 0x2de   :  { %v246_v40 = vpop.xlane.xlu1 %245 }
 0x2df   :  { %v248_v41 = vsub.f32 %v236_v32, %v246_v40 }
 0x2e1   :  { %v251_v42 = vmul.f32 1.442695, %v248_v41 }
 0x2e2   :  { %v266_v43 = vpop.permute.xlu1 %265 }
 0x2e3   :  { %1365 = vpow2.f32 %v251_v42  ;;  %v272_v44 = vsel %vm270_vm3, %v266_v43, 0 }
 0x2e4   :  { %1242 = vmatpush3.bf16.msra.mxu1 %v272_v44 }
 0x2e5   :  { %v1364_v45 = vpop.eup %1363  ;;  %1247 = vmatprep.subr.bf16.mxu1 %v1419_v1 }
 0x2e6   :  { %v315_v46 = vpop.permute.xlu1 %314  ;;  %v253_v47 = vsel %vm146_vm1, %v1364_v45, 0.0 }
 0x2e7   :  { %254 = vadd.xlane.f32.xlu0 %v253_v47  ;;  %v320_v58 = vsel %vm270_vm3, %v315_v46, 0 }
 0x2ea   :  { %v367_v48 = vpop.permute.xlu1 %366 }
 0x2eb   :  { %v372_v49 = vsel %vm146_vm1, %v367_v48, 0 }
 0x2ec   :  { %1254 = vmatpush3.bf16.xpose.msra.mxu0 %v372_v49 }
 0x2ed   :  { %v1366_v50 = vpop.eup %1365  ;;  %1265 = vmatprep.subr.bf16.mxu0 %v1419_v1 }
 0x2ee   :  { %v256_v51 = vsel %vm146_vm1, %v1366_v50, 0.0 }
 0x2ef   :  { %257 = vadd.xlane.f32.xlu1 %v256_v51 }
 0x2fd   :  { %364 = vrot.lane.b32.xlu0 %v1506_v11, %s1425_s8 }
 0x300   :  { %416 = vrot.lane.b32.xlu1 %v1509_v15, %s1424_s1 }
 0x304   :  { %414 = vrot.lane.b32.xlu1 %v1509_v15, %s1425_s8 }
 0x374   :  { %v255_v52 = vpop.xlane.xlu0 %254 }
 0x375   :  { %1367 = vrcp.f32 %v255_v52 }
 0x378   :  { %v365_v53 = vpop.permute.xlu0 %364 }
 0x379   :  { %1256 = vmatmul.mubr.msk.bf16.vlgmr.msra.gmra.mrb[4].mxu0 %vm146_vm1, %v365_v53 }
 0x37a   :  { %1267 = vmatprep.mubr.msk.bf16.mxu0 %vm1420_vm0, %v1419_v1 }
 0x37c   :  { %v258_v54 = vpop.xlane.xlu1 %257 }
 0x37d   :  { %1369 = vrcp.f32 %v258_v54 }
 0x37f   :  { %v1368_v55 = vpop.eup %1367 }
 0x380   :  { %v261_v56 = vmul.f32 %v1368_v55, %v1364_v45  ;;  %v417_v61 = vpop.permute.xlu1 %416 }
 0x381   :  { %v422_v63 = vsel %vm146_vm1, %v417_v61, 0 }
 0x382   :  { %v263_v57 = vpack.c.bf16 %v261_v56, %v261_v56 }
 0x384   :  { %1244 = vmatmul.mubr.msk.bf16.vlgmr.msra.gmra.mrb[8].mxu1 %vm146_vm1, %v263_v57  ;;  %v415_v0 = vpop.permute.xlu1 %414 }
 0x385   :  { %1248 = vmatpush3.bf16.msra.mxu1 %v320_v58  ;;  %1249 = vmatprep.mubr.msk.bf16.mxu1 %vm1420_vm0, %v1419_v1 }
 0x386   :  { %1259 = vmatprep.subr.bf16.mxu1 %v1419_v1 }
 0x387   :  { %v1370_v59 = vpop.eup %1369 }
 0x388   :  { %v262_v60 = vmul.f32 %v1370_v59, %v1366_v50 }
 0x38a   :  { %v264_v62 = vpack.c.bf16 %v262_v60, %v262_v60 }
 0x38c   :  { %1250 = vmatmul.mubr.msk.bf16.vlgmr.msra.gmra.mrb[12].mxu1 %vm146_vm1, %v264_v62 }
 0x38d   :  { %1261 = vmatprep.mubr.msk.bf16.mxu1 %vm1420_vm0, %v1419_v1 }
 0x38e   :  { %1260 = vmatpush3.bf16.xpose.msra.mxu1 %v422_v63 }
 0x38f   :  { %1271 = vmatprep.subr.bf16.mxu1 %v1419_v1 }
 0x395   :  { %1262 = vmatmul.mubr.msk.bf16.vlgmr.msra.gmra.mrb[16].mxu1 %vm146_vm1, %v415_v0 }
 0x396   :  { %1273 = vmatprep.mubr.msk.bf16.mxu1 %vm1420_vm0, %v1419_v1 }
 0x44c   :  { %v408_v2 = vpop.f32.mrb[4].mxu0 }
 0x44d   :  { %v409_v3 = vadd.f32 %v408_v2, %v1524_v24  ;;  %v1257_v4 = vpop.f32.mrb[5].mxu0 }
 0x44e   :  { %v411_v5 = vpop.f32.mrb[6].mxu0 }
 0x44f   :  { %v1258_v6 = vpop.f32.mrb[7].mxu0  ;;  %v464_v7 = vsel %vm146_vm1, %v409_v3, -inf }
 0x450   :  { %465 = vmax.xlane.f32.xlu1 %v464_v7 }
 0x457   :  { %v308_v8 = vpop.f32.mrb[8].mxu1 }
 0x458   :  { %v1245_v9 = vpop.f32.mrb[9].mxu1 }
 0x459   :  { %v311_v10 = vpop.f32.mrb[10].mxu1 }
 0x45a   :  { %v1246_v12 = vpop.f32.mrb[11].mxu1 }
 0x45f   :  { %v356_v13 = vpop.f32.mrb[12].mxu1 }
 0x460   :  { %v362_v14 = vpack.c.bf16 %v356_v13, %v308_v8  ;;  %v1251_v16 = vpop.f32.mrb[13].mxu1 }
 0x461   :  { %v359_v17 = vpop.f32.mrb[14].mxu1 }
 0x462   :  { %363 = vst.msk [vmem:[#allocation2] sm:$0xff] %vm146_vm1, %v362_v14  ;;  %v1252_v18 = vpop.f32.mrb[15].mxu1 }
 0x468   :  { %v458_v19 = vpop.f32.mrb[16].mxu1 }
 0x469   :  { %v459_v20 = vadd.f32 %v458_v19, %v1524_v24  ;;  %v1263_v21 = vpop.f32.mrb[17].mxu1 }
 0x46a   :  { %v461_v22 = vpop.f32.mrb[18].mxu1 }
 0x46b   :  { %v1264_v23 = vpop.f32.mrb[19].mxu1  ;;  %v467_v25 = vsel %vm146_vm1, %v459_v20, -inf }
 0x46c   :  { %468 = vmax.xlane.f32.xlu0 %v467_v25 }
 0x482   :  { %536 = vrot.lane.b32.xlu0 %v1509_v15, %s1426_s9 }
 0x486   :  { %591 = vrot.lane.b32.xlu0 %v1506_v11, %s1427_s10 }
 0x4dd   :  { %v466_v26 = vpop.xlane.xlu1 %465 }
 0x4de   :  { %v470_v27 = vsub.f32 %v409_v3, %v466_v26 }
 0x4e0   :  { %v472_v28 = vmul.f32 1.442695, %v470_v27 }
 0x4e2   :  { %1371 = vpow2.f32 %v472_v28 }
 0x4ec   :  { %v1372_v29 = vpop.eup %1371 }
 0x4ed   :  { %v476_v30 = vsel %vm146_vm1, %v1372_v29, 0.0 }
 0x4ee   :  { %477 = vadd.xlane.f32.xlu1 %v476_v30 }
 0x4f9   :  { %v469_v31 = vpop.xlane.xlu0 %468 }
 0x4fa   :  { %v471_v34 = vsub.f32 %v459_v20, %v469_v31 }
 0x4fc   :  { %v474_v35 = vmul.f32 1.442695, %v471_v34 }
 0x4fd   :  { %v537_v32 = vpop.permute.xlu0 %536 }
 0x4fe   :  { %v542_v33 = vsel %vm270_vm3, %v537_v32, 0  ;;  %1373 = vpow2.f32 %v474_v35 }
 0x4ff   :  { %1272 = vmatpush3.bf16.msra.mxu1 %v542_v33  ;;  %488 = vrot.lane.b32.xlu1 %v1506_v11, %s1426_s9 }
 0x500   :  { %1283 = vmatprep.subr.bf16.mxu1 %v1419_v1 }
 0x501   :  { %v592_v46 = vpop.permute.xlu0 %591 }
 0x503   :  { %593 = vrot.lane.b32.xlu1 %v1506_v11, %s1428_s11 }
 0x508   :  { %v1374_v36 = vpop.eup %1373 }
 0x509   :  { %v479_v37 = vsel %vm146_vm1, %v1374_v36, 0.0 }
 0x527   :  { %480 = vadd.xlane.f32.xlu1 %v479_v37 }
 0x538   :  { %643 = vrot.lane.b32.xlu1 %v1509_v15, %s1428_s11 }
 0x53c   :  { %641 = vrot.lane.b32.xlu1 %v1509_v15, %s1427_s10 }
 0x57b   :  { %v478_v38 = vpop.xlane.xlu1 %477 }
 0x57c   :  { %1375 = vrcp.f32 %v478_v38 }
 0x57f   :  { %v489_v39 = vpop.permute.xlu1 %488 }
 0x580   :  { %v494_v40 = vsel %vm270_vm3, %v489_v39, 0 }
 0x581   :  { %1266 = vmatpush3.bf16.msra.mxu0 %v494_v40 }
 0x582   :  { %1277 = vmatprep.subr.bf16.mxu0 %v1419_v1 }
 0x583   :  { %v594_v43 = vpop.permute.xlu1 %593 }
 0x584   :  { %v599_v45 = vsel %vm146_vm1, %v594_v43, 0 }
 0x586   :  { %v1376_v41 = vpop.eup %1375 }
 0x587   :  { %v484_v42 = vmul.f32 %v1376_v41, %v1372_v29 }
 0x589   :  { %v486_v44 = vpack.c.bf16 %v484_v42, %v484_v42 }
 0x58b   :  { %1268 = vmatmul.mubr.msk.bf16.vlgmr.msra.gmra.mrb[8].mxu0 %vm146_vm1, %v486_v44 }
 0x58c   :  { %1278 = vmatpush3.bf16.xpose.msra.mxu0 %v599_v45  ;;  %1279 = vmatprep.mubr.msk.bf16.mxu0 %vm1420_vm0, %v1419_v1 }
 0x58d   :  { %1289 = vmatprep.subr.bf16.mxu0 %v1419_v1 }
 0x593   :  { %1280 = vmatmul.mubr.msk.bf16.vlgmr.msra.gmra.mrb[12].mxu0 %vm146_vm1, %v592_v46 }
 0x594   :  { %1291 = vmatprep.mubr.msk.bf16.mxu0 %vm1420_vm0, %v1419_v1 }
 0x5b4   :  { %v481_v47 = vpop.xlane.xlu1 %480 }
 0x5b5   :  { %1377 = vrcp.f32 %v481_v47 }
 0x5b8   :  { %v644_v50 = vpop.permute.xlu1 %643 }
 0x5b9   :  { %v649_v52 = vsel %vm146_vm1, %v644_v50, 0 }
 0x5bc   :  { %v642_v53 = vpop.permute.xlu1 %641 }
 0x5bf   :  { %v1378_v48 = vpop.eup %1377 }
 0x5c0   :  { %v485_v49 = vmul.f32 %v1378_v48, %v1374_v36 }
 0x5c2   :  { %v487_v51 = vpack.c.bf16 %v485_v49, %v485_v49 }
 0x5c4   :  { %1274 = vmatmul.mubr.msk.bf16.vlgmr.msra.gmra.mrb[20].mxu1 %vm146_vm1, %v487_v51 }
 0x5c5   :  { %1284 = vmatpush3.bf16.xpose.msra.mxu1 %v649_v52  ;;  %1285 = vmatprep.mubr.msk.bf16.mxu1 %vm1420_vm0, %v1419_v1 }
 0x5c6   :  { %1295 = vmatprep.subr.bf16.mxu1 %v1419_v1 }
 0x5cc   :  { %1286 = vmatmul.mubr.msk.bf16.vlgmr.msra.gmra.mrb[24].mxu1 %vm146_vm1, %v642_v53 }
 0x5cd   :  { %1297 = vmatprep.mubr.msk.bf16.mxu1 %vm1420_vm0, %v1419_v1 }
 0x65e   :  { %v1591_v54 = vpop.f32.mrb[8].mxu0 }
 0x65f   :  { %v1269_v55 = vpop.f32.mrb[9].mxu0 }
 0x660   :  { %v533_v56 = vpop.f32.mrb[10].mxu0 }
 0x661   :  { %v1270_v57 = vpop.f32.mrb[11].mxu0 }
 0x666   :  { %v635_v58 = vpop.f32.mrb[12].mxu0 }
 0x667   :  { %v636_v59 = vadd.f32 %v635_v58, %v1524_v24  ;;  %v1281_v60 = vpop.f32.mrb[13].mxu0 }
 0x668   :  { %v638_v61 = vpop.f32.mrb[14].mxu0 }
 0x669   :  { %v1282_v62 = vpop.f32.mrb[15].mxu0  ;;  %v691_v63 = vsel %vm146_vm1, %v636_v59, -inf }
 0x66a   :  { %692 = vmax.xlane.f32.xlu0 %v691_v63 }
 0x697   :  { %v1595_v0 = vpop.f32.mrb[20].mxu1 }
 0x698   :  { %v584_v2 = vpack.c.bf16 %v1595_v0, %v1591_v54  ;;  %v1275_v3 = vpop.f32.mrb[21].mxu1 }
 0x699   :  { %v581_v4 = vpop.f32.mrb[22].mxu1 }
 0x69a   :  { %v1276_v5 = vpop.f32.mrb[23].mxu1 }
 0x69f   :  { %v685_v6 = vpop.f32.mrb[24].mxu1 }
 0x6a0   :  { %v686_v7 = vadd.f32 %v685_v6, %v1524_v24  ;;  %v1287_v8 = vpop.f32.mrb[25].mxu1 }
 0x6a1   :  { %v688_v9 = vpop.f32.mrb[26].mxu1 }
 0x6a2   :  { %v1288_v10 = vpop.f32.mrb[27].mxu1  ;;  %v694_v12 = vsel %vm146_vm1, %v686_v7, -inf }
 0x6a3   :  { %695 = vmax.xlane.f32.xlu1 %v694_v12 }
 0x6b4   :  { %715 = vrot.lane.b32.xlu1 %v1506_v11, %s1429_s12 }
 0x6b8   :  { %820 = vrot.lane.b32.xlu1 %v1506_v11, %s1430_s13 }
 0x6bc   :  { %870 = vrot.lane.b32.xlu1 %v1509_v15, %s1430_s13 }
 0x6c0   :  { %868 = vrot.lane.b32.xlu1 %v1509_v15, %s1431_s14 }
 0x6f7   :  { %v693_v13 = vpop.xlane.xlu0 %692 }
 0x6f8   :  { %v697_v14 = vsub.f32 %v636_v59, %v693_v13 }
 0x6fa   :  { %v699_v16 = vmul.f32 1.442695, %v697_v14 }
 0x6fc   :  { %1379 = vpow2.f32 %v699_v16 }
 0x706   :  { %v1380_v17 = vpop.eup %1379 }
 0x707   :  { %v703_v18 = vsel %vm146_vm1, %v1380_v17, 0.0 }
 0x708   :  { %704 = vadd.xlane.f32.xlu0 %v703_v18 }
 0x730   :  { %v696_v19 = vpop.xlane.xlu1 %695 }
 0x731   :  { %v698_v20 = vsub.f32 %v686_v7, %v696_v19 }
 0x733   :  { %v701_v21 = vmul.f32 1.442695, %v698_v20 }
 0x734   :  { %v716_v22 = vpop.permute.xlu1 %715 }
 0x735   :  { %1381 = vpow2.f32 %v701_v21  ;;  %v721_v23 = vsel %vm270_vm3, %v716_v22, 0 }
 0x736   :  { %1290 = vmatpush3.bf16.msra.mxu0 %v721_v23 }
 0x737   :  { %1301 = vmatprep.subr.bf16.mxu0 %v1419_v1 }
 0x738   :  { %v821_v30 = vpop.permute.xlu1 %820 }
 0x739   :  { %v826_v32 = vsel %vm146_vm1, %v821_v30, 0  ;;  %v1362_v30 = vld [vmem:[%s1673_s2 + $0x8] sm:$0xff]  }
 0x73c   :  { %v871_v39 = vpop.permute.xlu1 %870 }
 0x73d   :  { %v876_v41 = vsel %vm146_vm1, %v871_v39, 0 }
 0x73f   :  { %v1382_v25 = vpop.eup %1381 }
 0x740   :  { %v706_v26 = vsel %vm146_vm1, %v1382_v25, 0.0  ;;  %v869_v42 = vpop.permute.xlu1 %868 }
 0x741   :  { %707 = vadd.xlane.f32.xlu0 %v706_v26 }
 0x757   :  { %763 = vrot.lane.b32.xlu0 %v1509_v15, %s1429_s12 }
 0x75b   :  { %818 = vrot.lane.b32.xlu0 %v1506_v11, %s1431_s14 }
 0x795   :  { %v705_v27 = vpop.xlane.xlu0 %704 }
 0x796   :  { %1383 = vrcp.f32 %v705_v27 }
 0x7a0   :  { %v1384_v28 = vpop.eup %1383 }
 0x7a1   :  { %v711_v29 = vmul.f32 %v1384_v28, %v1380_v17 }
 0x7a3   :  { %v713_v31 = vpack.c.bf16 %v711_v29, %v711_v29  ;;  %v1361_v29 = vld [vmem:[%s1673_s2] sm:$0xff]   ;;  %s1436_s2 = smov [#allocation3]  }
 0x7a4   :  { %s1121_s25 = sshll.u32 %s1436_s2, 4  ;;  %s1122_s25 = int_to_ptr.vmem [resolvable:$true] %s1121_s25 }
 0x7a5   :  { %1292 = vmatmul.mubr.msk.bf16.vlgmr.msra.gmra.mrb[16].mxu0 %vm146_vm1, %v713_v31  ;;  %s1395_s26 = scalar_lea.vmem %s1122_s25, 256  ;;  %p1400_p1 = scmp.lt.s32.totalorder %s1122_s25, %s1122_s25 }
 0x7a6   :  { %1302 = vmatpush3.bf16.xpose.msra.mxu0 %v826_v32  ;;  %1303 = vmatprep.mubr.msk.bf16.mxu0 %vm1420_vm0, %v1419_v1  ;;  %p1396_p0 = scmp.ne.s32.totalorder %s1122_s25, %s1395_s26  ;;  %p1401_p2 = scmp.lt.s32.totalorder %s1395_s26, %s1395_s26 }
 0x7a7   :  { %1313 = vmatprep.subr.bf16.mxu0 %v1419_v1 }
 0x7a8   :  { %p1402_p3 = por %p1401_p2, %p1400_p1 }
 0x7aa   :  { %p1403_p4 = pnand %p1402_p3, %p1396_p0 }
 0x7ce   :  { %v708_v33 = vpop.xlane.xlu0 %707 }
 0x7cf   :  { %1385 = vrcp.f32 %v708_v33 }
 0x7d2   :  { %v764_v34 = vpop.permute.xlu0 %763 }
 0x7d3   :  { %v769_v35 = vsel %vm270_vm3, %v764_v34, 0 }
 0x7d4   :  { %1296 = vmatpush3.bf16.msra.mxu1 %v769_v35 }
 0x7d5   :  { %1307 = vmatprep.subr.bf16.mxu1 %v1419_v1 }
 0x7d6   :  { %v819_v36 = vpop.permute.xlu0 %818 }
 0x7d7   :  { %1304 = vmatmul.mubr.msk.bf16.vlgmr.msra.gmra.mrb[20].mxu0 %vm146_vm1, %v819_v36 }
 0x7d8   :  { %1315 = vmatprep.mubr.msk.bf16.mxu0 %vm1420_vm0, %v1419_v1 }
 0x7d9   :  { %v1386_v37 = vpop.eup %1385 }
 0x7da   :  { %v712_v38 = vmul.f32 %v1386_v37, %v1382_v25 }
 0x7dc   :  { %v714_v40 = vpack.c.bf16 %v712_v38, %v712_v38  ;;  %v1159_v38 = vld [vmem:[%s1674_s3] ss:$0 sm:$0xff] }
 0x7de   :  { %1298 = vmatmul.mubr.msk.bf16.vlgmr.msra.gmra.mrb[28].mxu1 %vm146_vm1, %v714_v40 }
 0x7df   :  { %1308 = vmatpush3.bf16.xpose.msra.mxu1 %v876_v41  ;;  %1309 = vmatprep.mubr.msk.bf16.mxu1 %vm1420_vm0, %v1419_v1 }
 0x7e0   :  { %1319 = vmatprep.subr.bf16.mxu1 %v1419_v1 }
 0x7e6   :  { %1310 = vmatmul.mubr.msk.bf16.vlgmr.msra.gmra.mrb[32].mxu1 %vm146_vm1, %v869_v42 }
 0x7e7   :  { %1321 = vmatprep.mubr.msk.bf16.mxu1 %vm1420_vm0, %v1419_v1 }
 0x878   :  { %v757_v43 = vpop.f32.mrb[16].mxu0 }
 0x879   :  { %v1293_v44 = vpop.f32.mrb[17].mxu0 }
 0x87a   :  { %v760_v45 = vpop.f32.mrb[18].mxu0 }
 0x87b   :  { %v1294_v46 = vpop.f32.mrb[19].mxu0 }
 0x8aa   :  { %v862_v47 = vpop.f32.mrb[20].mxu0 }
 0x8ab   :  { %v863_v48 = vadd.f32 %v862_v47, %v1524_v24  ;;  %v1305_v49 = vpop.f32.mrb[21].mxu0 }
 0x8ac   :  { %v865_v50 = vpop.f32.mrb[22].mxu0 }
 0x8ad   :  { %v1306_v51 = vpop.f32.mrb[23].mxu0  ;;  %v918_v52 = vsel %vm146_vm1, %v863_v48, -inf }
 0x8ae   :  { %919 = vmax.xlane.f32.xlu0 %v918_v52 }
 0x8b1   :  { %v805_v53 = vpop.f32.mrb[28].mxu1 }
 0x8b2   :  { %v811_v55 = vpack.c.bf16 %v805_v53, %v757_v43  ;;  %v1299_v56 = vpop.f32.mrb[29].mxu1 }
 0x8b3   :  { %v808_v57 = vpop.f32.mrb[30].mxu1 }
 0x8b4   :  { %v1300_v58 = vpop.f32.mrb[31].mxu1 }
 0x8b9   :  { %v912_v59 = vpop.f32.mrb[32].mxu1 }
 0x8ba   :  { %v913_v60 = vadd.f32 %v912_v59, %v1524_v24  ;;  %v1311_v61 = vpop.f32.mrb[33].mxu1 }
 0x8bb   :  { %v915_v62 = vpop.f32.mrb[34].mxu1 }
 0x8bc   :  { %v1312_v63 = vpop.f32.mrb[35].mxu1  ;;  %v921_v3 = vsel %vm146_vm1, %v913_v60, -inf }
 0x8bd   :  { %922 = vmax.xlane.f32.xlu1 %v921_v3 }
 0x8ce   :  { %942 = vrot.lane.b32.xlu1 %v1506_v11, %s1432_s15 }
 0x8d2   :  { %586 = vrot.lane.b32.xlu1 %v584_v2, %s1433_s16 }
 0x8d6   :  { %813 = vrot.lane.b32.xlu1 %v811_v55, %s1434_s17 }
 0x93b   :  { %v920_v4 = vpop.xlane.xlu0 %919 }
 0x93c   :  { %v924_v5 = vsub.f32 %v863_v48, %v920_v4 }
 0x93e   :  { %v926_v24 = vmul.f32 1.442695, %v924_v5 }
 0x940   :  { %1387 = vpow2.f32 %v926_v24 }
 0x94a   :  { %v1388_v6 = vpop.eup %1387  ;;  %v923_v7 = vpop.xlane.xlu1 %922 }
 0x94b   :  { %v925_v8 = vsub.f32 %v913_v60, %v923_v7  ;;  %v930_v9 = vsel %vm146_vm1, %v1388_v6, 0.0 }
 0x94c   :  { %931 = vadd.xlane.f32.xlu0 %v930_v9 }
 0x94d   :  { %v928_v10 = vmul.f32 1.442695, %v925_v8 }
 0x94e   :  { %v943_v11 = vpop.permute.xlu1 %942 }
 0x94f   :  { %1389 = vpow2.f32 %v928_v10  ;;  %v948_v12 = vsel %vm270_vm3, %v943_v11, 0 }
 0x950   :  { %1314 = vmatpush3.bf16.msra.mxu0 %v948_v12 }
 0x951   :  { %1325 = vmatprep.subr.bf16.mxu0 %v1419_v1 }
 0x952   :  { %v587_v54 = vpop.permute.xlu1 %586 }
 0x953   :  { %590 = vst.msk [vmem:[#allocation2] sm:$0xff] %vm589_vm4, %v587_v54 }
 0x956   :  { %v814_v0 = vpop.permute.xlu1 %813 }
 0x957   :  { %817 = vst.msk [vmem:[#allocation2] sm:$0xff] %vm816_vm5, %v814_v0 }
 0x959   :  { %v1390_v2 = vpop.eup %1389 }
 0x95a   :  { %v933_v13 = vsel %vm146_vm1, %v1390_v2, 0.0 }
 0x95b   :  { %934 = vadd.xlane.f32.xlu0 %v933_v13 }
 0x971   :  { %990 = vrot.lane.b32.xlu0 %v1509_v15, %s1432_s15 }
 0x9d9   :  { %v932_v14 = vpop.xlane.xlu0 %931 }
 0x9da   :  { %1391 = vrcp.f32 %v932_v14 }
 0x9e4   :  { %v1392_v16 = vpop.eup %1391 }
 0x9e5   :  { %v938_v17 = vmul.f32 %v1392_v16, %v1388_v6 }
 0x9e7   :  { %v940_v18 = vpack.c.bf16 %v938_v17, %v938_v17 }
 0x9e8   :  { %v935_v19 = vpop.xlane.xlu0 %934 }
 0x9e9   :  { %1393 = vrcp.f32 %v935_v19  ;;  %1316 = vmatmul.mubr.msk.bf16.vlgmr.msra.gmra.mrb[24].mxu0 %vm146_vm1, %v940_v18 }
 0x9ea   :  { %1329 = vmatprep.mubr.msk.bf16.mxu0 %vm1420_vm0, %v1419_v1  ;;  %1326 = vmatpush3.bf16.msra.mxu0 %v1361_v29 }
 0x9eb   :  { %1327 = vmatprep.subr.bf16.mxu0 %v1419_v1 }
 0x9ec   :  { %v991_v20 = vpop.permute.xlu0 %990 }
 0x9ed   :  { %v996_v21 = vsel %vm270_vm3, %v991_v20, 0 }
 0x9ee   :  { %1320 = vmatpush3.bf16.msra.mxu1 %v996_v21  ;;  %1328 = vmatpush3.bf16.msra.mxu0 %v1362_v30 }
 0x9f3   :  { %v1394_v22 = vpop.eup %1393 }
 0x9f4   :  { %v939_v23 = vmul.f32 %v1394_v22, %v1390_v2 }
 0x9f6   :  { %v941_v25 = vpack.c.bf16 %v939_v23, %v939_v23 }
 0x9f8   :  { %1322 = vmatmul.mubr.msk.bf16.vlgmr.msra.gmra.mrb[36].mxu1 %vm146_vm1, %v941_v25 }
 0xabc   :  { %v984_v15 = vpop.f32.mrb[24].mxu0 }
 0xabd   :  { %v1317_v26 = vpop.f32.mrb[25].mxu0 }
 0xabe   :  { %v987_v27 = vpop.f32.mrb[26].mxu0 }
 0xabf   :  { %v1318_v28 = vpop.f32.mrb[27].mxu0 }
 0xacb   :  { %v1032_v31 = vpop.f32.mrb[36].mxu1 }
 0xacc   :  { %v1038_v32 = vpack.c.bf16 %v1032_v31, %v984_v15  ;;  %v1323_v33 = vpop.f32.mrb[37].mxu1 }
 0xacd   :  { %v1035_v34 = vpop.f32.mrb[38].mxu1 }
 0xace   :  { %v1324_v35 = vpop.f32.mrb[39].mxu1  ;;  %1040 = vrot.lane.b32.xlu0 %v1038_v32, %s1435_s22 }
 0xb40   :  { %v1041_v36 = vpop.permute.xlu0 %1040 }
 0xb41   :  { %1044 = vst.msk [vmem:[#allocation2] sm:$0xff] %vm1043_vm6, %v1041_v36 }
 0xb48   :  { %v1045_v37 = vld [vmem:[#allocation2] sm:$0xff] }
 0xb49   :  { %1330 = vmatmul.mubr.msk.bf16.vlgmr.msra.gmra.mrb[28].mxu0 %vm1069_vm7, %v1045_v37 }
 0xc1c   :  { %v1107_v39 = vpop.f32.mrb[28].mxu0 }
 0xc1d   :  { %v1108_v1 = vadd.f32 %v1159_v38, %v1107_v39  ;;  %v1331_v40 = vpop.f32.mrb[29].mxu0 }
 0xc1e   :  { %v1110_v41 = vpop.f32.mrb[30].mxu0 }
 0xc1f   :  { %1114 = vst [vmem:[#allocation3] sm:$0xff] %v1108_v1  ;;  %v1111_v42 = vadd.f32 %v1159_v38, %v1110_v41  ;;  %v1332_v43 = vpop.f32.mrb[31].mxu0 }
 0xc21   :  { %1115 = vst [vmem:[#allocation3 + $0x8] sm:$0xff] %v1111_v42 }
 0xc22   :  { %1406 = shalt.err (!%p1403_p4)
}
 0xc23   :  { %s1407_s28 = scalar_lea.hbm %s1675_s4, 256 }
 0xc24   :  { %p1408_p5 = scmp.ne.s32.totalorder %s1675_s4, %s1407_s28  ;;  %p1411_p6 = scmp.lt.u32.totalorder %s1407_s28, %s1675_s4 }
 0xc26   :  { %p1413_p7 = pnand %p1411_p6, %p1408_p5 }
 0xc28   :  { %1416 = shalt.err (!%p1413_p7)
}
 0xc29   :  { %s1437_s7 = smov 128  }
 0xc2a   :  { %1127 = dma.vmem_to_hbm [thread:$0]  %s1122_s25, 256, %s1675_s4, [#allocation4], %s1437_s7, %s1437_s7, %s1433_s16  }
 0xc2b   :  { %1417 = dma.done.wait [#allocation4], 256  }
 0xc2c   :  { %1418 = vsyncadd [#allocation4], 4294967040 }
 0xc2d   :  { %1131 = vsyncpa [#allocation4], 1 }

</bundles_post_ra>
